<compile_context>
chip_gen: v7x
topology: tpu7x:2x2x1
jax: 0.10.0
libtpu: 0.0.40
codegen_flags: <defaults>
</compile_context>

<pallas_src>
import functools

import jax
import jax.numpy as jnp
from jax import lax
from jax.experimental import pallas as pl
from jax.experimental.pallas import tpu as pltpu


def _round_up(v, m):
    return ((v + m - 1) // m) * m


def _dot_nt(x, w):
    # x: (tm, tk), w: (tn, tk) torch layout -> (tm, tn), f32 accumulation.
    return lax.dot_general(
        x, w,
        dimension_numbers=(((1,), (1,)), ((), ())),
        preferred_element_type=jnp.float32,
    )


def _linear_kernel_f32out(x_ref, w_ref, b_ref, o_ref):
    """f32 output: accumulate directly into the resident output block."""
    k = pl.program_id(2)

    @pl.when(k == 0)
    def _init():
        o_ref[...] = jnp.zeros_like(o_ref)

    o_ref[...] += _dot_nt(x_ref[...], w_ref[...])

    @pl.when(k == pl.num_programs(2) - 1)
    def _bias():
        o_ref[...] += b_ref[...].astype(jnp.float32)


def _linear_kernel_acc(x_ref, w_ref, b_ref, o_ref, acc_ref):
    """Narrow output dtype: f32 scratch accumulator, single cast at store."""
    k = pl.program_id(2)

    @pl.when(k == 0)
    def _init():
        acc_ref[...] = jnp.zeros_like(acc_ref)

    acc_ref[...] += _dot_nt(x_ref[...], w_ref[...])

    @pl.when(k == pl.num_programs(2) - 1)
    def _epilogue():
        o_ref[...] = (
            acc_ref[...] + b_ref[...].astype(jnp.float32)
        ).astype(o_ref.dtype)


@functools.partial(jax.jit, static_argnames=("tm", "tn", "tk", "compute_dtype"))
def linear(x, w, b, *, tm=512, tn=512, tk=1024, compute_dtype=None):
    """PyTorch nn.Linear semantics: y = x @ w.T + b.

    x: (..., K) input, w: (N, K) weight (torch layout), b: (N,) bias.
    compute_dtype: optionally cast x/w (e.g. jnp.bfloat16) for the fast MXU
    path; accumulation stays f32 and the output dtype stays x.dtype.
    """
    orig_shape = x.shape
    out_dtype = x.dtype
    K = orig_shape[-1]
    N = w.shape[0]
    M = x.size // K

    x2 = x.reshape(M, K)
    w2 = w                      # keep torch (N, K) layout — no transpose pass
    b2 = b.reshape(1, N)
    if compute_dtype is not None:
        x2 = x2.astype(compute_dtype)
        w2 = w2.astype(compute_dtype)

    in_dtype = jnp.dtype(x2.dtype)
    # Sublane packing: 8 rows for 4-byte dtypes, 16 for 2-byte, 32 for 1-byte.
    sub = 8 * max(1, 4 // in_dtype.itemsize)

    # Clamp tiles to the (rounded) problem so tiny Linear layers don't pay for
    # 512-wide tiles, while staying (8,128)-legal and lane-dense.
    tm = min(tm, _round_up(M, sub))
    tn = min(tn, _round_up(N, 128))
    tk = min(tk, _round_up(K, 128))

    # v7x megacore: make sure there are >=2 parallel output blocks.
    while pl.cdiv(M, tm) * pl.cdiv(N, tn) < 2:
        if tm >= 2 * sub:
            tm = max(sub, (tm // 2 // sub) * sub)
        elif tn >= 256:
            tn = max(128, (tn // 2 // 128) * 128)
        else:
            break

    Mp = pl.cdiv(M, tm) * tm
    Kp = pl.cdiv(K, tk) * tk
    Np = pl.cdiv(N, tn) * tn

    # Only materialize pads when actually misaligned (common transformer case
    # is fully aligned -> zero extra HBM traffic in the wrapper).
    if (Mp, Kp) != (M, K):
        x2 = jnp.pad(x2, ((0, Mp - M), (0, Kp - K)))
    if (Np, Kp) != (N, K):
        w2 = jnp.pad(w2, ((0, Np - N), (0, Kp - K)))
    if Np != N:
        b2 = jnp.pad(b2, ((0, 0), (0, Np - N)))

    grid = (Mp // tm, Np // tn, Kp // tk)

    direct_f32 = jnp.dtype(out_dtype) == jnp.float32
    if direct_f32:
        kernel = _linear_kernel_f32out
        scratch_shapes = []
        acc_bytes = 0
    else:
        kernel = _linear_kernel_acc
        scratch_shapes = [pltpu.VMEM((tm, tn), jnp.float32)]
        acc_bytes = tm * tn * 4

    itm_x = x2.dtype.itemsize
    itm_w = w2.dtype.itemsize
    itm_b = b2.dtype.itemsize
    itm_o = jnp.dtype(out_dtype).itemsize

    # Double-buffered per-tile footprint; give the compiler an explicit scoped
    # VMEM limit with headroom (stays within v7x's 64 MiB physical VMEM).
    buf_bytes = 2 * (tm * tk * itm_x + tn * tk * itm_w + tn * itm_b
                     + tm * tn * itm_o)
    vmem_limit = int(min(max(2 * (buf_bytes + acc_bytes), 16 << 20), 48 << 20))

    cost = pl.CostEstimate(
        flops=2 * Mp * Np * Kp,
        transcendentals=0,
        bytes_accessed=int(
            Mp * Kp * itm_x * (Np // tn)        # x re-read per N tile
            + Np * Kp * itm_w * (Mp // tm)      # w re-read per M tile
            + Np * itm_b * (Mp // tm)
            + Mp * Np * itm_o
        ),
    )

    out = pl.pallas_call(
        kernel,
        out_shape=jax.ShapeDtypeStruct((Mp, Np), out_dtype),
        grid_spec=pltpu.PrefetchScalarGridSpec(
            num_scalar_prefetch=0,
            grid=grid,
            in_specs=[
                pl.BlockSpec((tm, tk), lambda i, j, k: (i, k)),   # x  (M, K)
                pl.BlockSpec((tn, tk), lambda i, j, k: (j, k)),   # W  (N, K)
                pl.BlockSpec((1, tn), lambda i, j, k: (0, j)),    # bias
            ],
            out_specs=pl.BlockSpec((tm, tn), lambda i, j, k: (i, j)),
            scratch_shapes=scratch_shapes,
        ),
        compiler_params=pltpu.CompilerParams(
            dimension_semantics=("parallel", "parallel", "arbitrary"),
            vmem_limit_bytes=vmem_limit,
        ),
        cost_estimate=cost,
    )(x2, w2, b2)

    y = out[:M, :N]
    return y.reshape(*orig_shape[:-1], N)


if __name__ == "__main__":
    key = jax.random.PRNGKey(0)
    kx, kw, kb = jax.random.split(key, 3)

    # Small shapes consistent with a Linear forward: (batch, seq, indim).
    batch, seq, indim, outdim = 2, 8, 32, 64
    x = jax.random.normal(kx, (batch, seq, indim), dtype=jnp.float32)
    w = jax.random.normal(kw, (outdim, indim), dtype=jnp.float32) * 0.1
    b = jax.random.normal(kb, (outdim,), dtype=jnp.float32) * 0.1

    y = linear(x, w, b)
    jax.block_until_ready(y)

    # Reference: PyTorch nn.Linear semantics (y = x @ W^T + b).
    y_ref = jnp.einsum("bsk,nk->bsn", x, w) + b

    assert y.shape == (batch, seq, outdim)
    assert y.dtype == x.dtype
    assert bool(jnp.allclose(y, y_ref, atol=1e-4, rtol=1e-4))

    print("KERNEL_OK")
</pallas_src>

<mosaic_0001>
module attributes {stable_mosaic.version = 11 : i64} {
  func.func @_linear_kernel_f32out(%arg0: i32, %arg1: i32, %arg2: i32, %arg3: memref<8x128xf32, #tpu.memory_space<vmem>>, %arg4: memref<128x128xf32, #tpu.memory_space<vmem>>, %arg5: memref<1x128xf32, #tpu.memory_space<vmem>>, %arg6: memref<8x128xf32, #tpu.memory_space<vmem>>) attributes {dimension_semantics = [#tpu.dimension_semantics<parallel>, #tpu.dimension_semantics<parallel>, #tpu.dimension_semantics<arbitrary>], iteration_bounds = array<i64: 2, 1, 1>, scalar_prefetch = 0 : i64, scratch_operands = 0 : i64, tpu.core_type = #tpu.core_type<tc>, window_params = [{transform_indices = @transform_0, window_bounds = array<i64: 8, 128>}, {transform_indices = @transform_1, window_bounds = array<i64: 128, 128>}, {transform_indices = @transform_2, window_bounds = array<i64: 1, 128>}, {transform_indices = @transform_3, window_bounds = array<i64: 8, 128>}]} {
    %c0_i32 = arith.constant 0 : i32
    %0 = arith.cmpi eq, %arg2, %c0_i32 : i32
    %1 = arith.extui %0 : i1 to i32
    %c0_i32_0 = arith.constant 0 : i32
    %2 = arith.cmpi ne, %1, %c0_i32_0 : i32
    scf.if %2 {
      %cst_10 = arith.constant 0.000000e+00 : f32
      %12 = vector.broadcast %cst_10 : f32 to vector<8x128xf32>
      %c0_11 = arith.constant 0 : index
      %c0_12 = arith.constant 0 : index
      %13 = vector.load %arg6[%c0_11, %c0_12] : memref<8x128xf32, #tpu.memory_space<vmem>>, vector<8x128xf32>
      tpu.vector_store %arg6[%c0_11, %c0_12], %12 {strides = array<i32>} : memref<8x128xf32, #tpu.memory_space<vmem>>, vector<8x128xf32>,
    } else {
    }
    %c0 = arith.constant 0 : index
    %c0_1 = arith.constant 0 : index
    %3 = vector.load %arg6[%c0, %c0_1] : memref<8x128xf32, #tpu.memory_space<vmem>>, vector<8x128xf32>
    %c0_2 = arith.constant 0 : index
    %c0_3 = arith.constant 0 : index
    %4 = vector.load %arg3[%c0_2, %c0_3] : memref<8x128xf32, #tpu.memory_space<vmem>>, vector<8x128xf32>
    %c0_4 = arith.constant 0 : index
    %c0_5 = arith.constant 0 : index
    %5 = vector.load %arg4[%c0_4, %c0_5] : memref<128x128xf32, #tpu.memory_space<vmem>>, vector<128x128xf32>
    %cst = arith.constant dense<0.000000e+00> : vector<8x128xf32>
    %6 = tpu.matmul %4, %5, %cst {dimension_numbers = #tpu.dot_dimension_numbers<[1], [1], [0], [0], [0, 0, 1, 0], [], []>} : vector<8x128xf32>, vector<128x128xf32>, vector<8x128xf32> -> vector<8x128xf32>
    %7 = arith.addf %3, %6 : vector<8x128xf32>
    %c0_6 = arith.constant 0 : index
    %c0_7 = arith.constant 0 : index
    %8 = vector.load %arg6[%c0_6, %c0_7] : memref<8x128xf32, #tpu.memory_space<vmem>>, vector<8x128xf32>
    tpu.vector_store %arg6[%c0_6, %c0_7], %7 {strides = array<i32>} : memref<8x128xf32, #tpu.memory_space<vmem>>, vector<8x128xf32>,
    %c0_i32_8 = arith.constant 0 : i32
    %9 = arith.cmpi eq, %arg2, %c0_i32_8 : i32
    %10 = arith.extui %9 : i1 to i32
    %c0_i32_9 = arith.constant 0 : i32
    %11 = arith.cmpi ne, %10, %c0_i32_9 : i32
    scf.if %11 {
      %c0_10 = arith.constant 0 : index
      %c0_11 = arith.constant 0 : index
      %12 = vector.load %arg6[%c0_10, %c0_11] : memref<8x128xf32, #tpu.memory_space<vmem>>, vector<8x128xf32>
      %c0_12 = arith.constant 0 : index
      %c0_13 = arith.constant 0 : index
      %13 = vector.load %arg5[%c0_12, %c0_13] : memref<1x128xf32, #tpu.memory_space<vmem>>, vector<1x128xf32>
      %14 = vector.broadcast %13 : vector<1x128xf32> to vector<8x128xf32>
      %15 = arith.addf %12, %14 : vector<8x128xf32>
      %c0_14 = arith.constant 0 : index
      %c0_15 = arith.constant 0 : index
      %16 = vector.load %arg6[%c0_14, %c0_15] : memref<8x128xf32, #tpu.memory_space<vmem>>, vector<8x128xf32>
      tpu.vector_store %arg6[%c0_14, %c0_15], %15 {strides = array<i32>} : memref<8x128xf32, #tpu.memory_space<vmem>>, vector<8x128xf32>,
    } else {
    }
    return
  }
  func.func @transform_0(%arg0: i32, %arg1: i32, %arg2: i32) -> (i32, i32) {
    %c0_i32 = arith.constant 0 : i32
    return %arg0, %arg2 : i32, i32
  }
  func.func @transform_1(%arg0: i32, %arg1: i32, %arg2: i32) -> (i32, i32) {
    %c0_i32 = arith.constant 0 : i32
    return %arg1, %arg2 : i32, i32
  }
  func.func @transform_2(%arg0: i32, %arg1: i32, %arg2: i32) -> (i32, i32) {
    %c0_i32 = arith.constant 0 : i32
    %c0_i32_0 = arith.constant 0 : i32
    return %c0_i32, %arg1 : i32, i32
  }
  func.func @transform_3(%arg0: i32, %arg1: i32, %arg2: i32) -> (i32, i32) {
    %c0_i32 = arith.constant 0 : i32
    return %arg0, %arg1 : i32, i32
  }
}

</mosaic_0001>

<bundles_post_ra>
// kernel: linear.1
= control target key start
LH: loop header
LB: loop body
LE: loop exit
PB: predicated region body
PF: predicated region fallthrough
CT: control target
= control target key end

     0   :  { %s629_s12 = smov 0   ;;  %s631_s13 = smov 0   ;;  %s717_s0 = inlined_call_operand.vmem [shape: f32[16,128], index: 0, kind: input, shape index: {}]   ;;  %s718_s1 = inlined_call_operand.vmem [shape: f32[128,128], index: 1, kind: input, shape index: {}]   ;;  %s719_s2 = inlined_call_operand.vmem [shape: f32[1,128], index: 2, kind: input, shape index: {}]   ;;  %s720_s3 = inlined_call_operand.vmem [shape: f32[16,128], index: 3, kind: output, shape index: {}]  }
   0x1   :  { %s633_s14 = smov 0  }
   0x2 LB: > { %s32_s15 = sadd.s32 1, %s600_s13  ;;  %p473_p0 = scmp.ge.s32.totalorder %s604_s14, 1  ;;  %s604_s14 = sphi %s633_s14, %s13_s14   ;;  %s600_s13 = sphi %s631_s13, %s722_s13   ;;  %s596_s12 = sphi %s629_s12, %s721_s12  }
   0x3   : > { %p34_p1 = scmp.ge.s32.totalorder %s32_s15, 2  ;;  %p186_p2 = scmp.lt.s32.totalorder %s604_s14, 3 }
   0x5   : > { %s724_s15 = smov (%p34_p1, %s32_s15), 0  ;;  %p187_p3 = pnand %p473_p0, %p186_p2 }
   0x6   : > { %v258_v0 = vld [vmem:[%s718_s1] sm:$0xff] (!%p187_p3)  ;;  %v259_v1 = vld [vmem:[%s718_s1 + $0x8] sm:$0xff] (!%p187_p3)  ;;  %v606_v2 = vmov (!%p187_p3), 0.0|0.0   ;;  %vm607_vm0 = vmmov (!%p187_p3), 0   ;;  %v608_v4 = vmov (!%p187_p3), 0.0   ;;  %v260_v5 = vld [vmem:[%s718_s1 + $0x10] sm:$0xff] (!%p187_p3) }
   0x7   : > { %190 = sbr.rel (%p187_p3) target bundleno = 287 (0x11f), region = 32  ;;  %531 = vmatprep.subr.bf16.mxu0 (!%p187_p3), %v606_v2  ;;  %v532_v3 = vpack.c.bf16 (!%p187_p3), %v259_v1, %v258_v0  ;;  %528 = vmatprep.mubr.msk.f32.mxu0 (!%p187_p3), %vm607_vm0, %v608_v4  ;;  %v261_v6 = vld [vmem:[%s718_s1 + $0x18] sm:$0xff] (!%p187_p3)  ;;  %v262_v8 = vld [vmem:[%s718_s1 + $0x20] sm:$0xff] (!%p187_p3)  ;;  %v263_v9 = vld [vmem:[%s718_s1 + $0x28] sm:$0xff] (!%p187_p3)  ;;  %p225_p4 = scmp.lt.s32.totalorder (!%p187_p3), %s596_s12, 1 }
   0x8   : > { %v535_v7 = vpack.c.bf16 (!%p187_p3), %v261_v6, %v260_v5  ;;  %v538_v10 = vpack.c.bf16 (!%p187_p3), %v263_v9, %v262_v8  ;;  %v264_v11 = vld [vmem:[%s718_s1 + $0x30] sm:$0xff] (!%p187_p3)  ;;  %v265_v12 = vld [vmem:[%s718_s1 + $0x38] sm:$0xff] (!%p187_p3)  ;;  %v266_v14 = vld [vmem:[%s718_s1 + $0x40] sm:$0xff] (!%p187_p3) }
   0x9   : > { %533 = vmatpush3.bf16.xpose.msra.mxu0 (!%p187_p3), %v532_v3  ;;  %v541_v13 = vpack.c.bf16 (!%p187_p3), %v265_v12, %v264_v11  ;;  %v267_v15 = vld [vmem:[%s718_s1 + $0x48] sm:$0xff] (!%p187_p3)  ;;  %v268_v17 = vld [vmem:[%s718_s1 + $0x50] sm:$0xff] (!%p187_p3)  ;;  %v269_v18 = vld [vmem:[%s718_s1 + $0x58] sm:$0xff] (!%p187_p3) }
   0xa   : > { %534 = vmatprep.subr.bf16.mxu0 (!%p187_p3), %v606_v2  ;;  %v544_v16 = vpack.c.bf16 (!%p187_p3), %v267_v15, %v266_v14  ;;  %v547_v19 = vpack.c.bf16 (!%p187_p3), %v269_v18, %v268_v17  ;;  %v270_v20 = vld [vmem:[%s718_s1 + $0x60] sm:$0xff] (!%p187_p3)  ;;  %v271_v21 = vld [vmem:[%s718_s1 + $0x68] sm:$0xff] (!%p187_p3)  ;;  %v272_v23 = vld [vmem:[%s718_s1 + $0x70] sm:$0xff] (!%p187_p3) }
   0xb   : > { %v550_v22 = vpack.c.bf16 (!%p187_p3), %v271_v21, %v270_v20  ;;  %v273_v24 = vld [vmem:[%s718_s1 + $0x78] sm:$0xff] (!%p187_p3)  ;;  %v476_v28 = vld [vmem:[%s719_s2] ss:$0 sm:$0xff] (!%p187_p3) }
   0xc   : > { %v553_v25 = vpack.c.bf16 (!%p187_p3), %v273_v24, %v272_v23 }
   0xe   : > { %s726_s12 = smov (!%p225_p4, %s596_s12), 1 }
   0xf   : > { %s474_s25 = sshll.u32 %s726_s12, 3 }
  0x10   : > { %s231_s28 = scalar_lea.vmem %s717_s0, %s474_s25  ;;  %s250_s6 = scalar_lea.vmem %s720_s3, %s474_s25 }
  0x11   : > { %536 = vmatpush3.bf16.xpose.msra.mxu0 %v535_v7  ;;  %v257_v26 = vld [vmem:[%s231_s28] sm:$0xff] }
  0x12   : > { %537 = vmatprep.subr.bf16.mxu0 %v606_v2 }
  0x19   : > { %539 = vmatpush3.bf16.xpose.msra.mxu0 %v538_v10 }
  0x1a   : > { %540 = vmatprep.subr.bf16.mxu0 %v606_v2 }
  0x21   : > { %542 = vmatpush3.bf16.xpose.msra.mxu0 %v541_v13 }
  0x22   : > { %543 = vmatprep.subr.bf16.mxu0 %v606_v2 }
  0x29   : > { %545 = vmatpush3.bf16.xpose.msra.mxu0 %v544_v16 }
  0x2a   : > { %546 = vmatprep.subr.bf16.mxu0 %v606_v2 }
  0x31   : > { %548 = vmatpush3.bf16.xpose.msra.mxu0 %v547_v19 }
  0x32   : > { %549 = vmatprep.subr.bf16.mxu0 %v606_v2 }
  0x39   : > { %551 = vmatpush3.bf16.xpose.msra.mxu0 %v550_v22 }
  0x3a   : > { %552 = vmatprep.subr.bf16.mxu0 %v606_v2 }
  0x41   : > { %554 = vmatpush3.bf16.xpose.msra.mxu0 %v553_v25 }
  0x48   : > { %529 = vmatmul.mubr.f32.vlgmr.msra.gmra.mrb[0].mxu0 %v257_v26 }
 0x11b   : > { %v340_v27 = vpop.f32.mrb[0].mxu0 }
 0x11c   : > { %v530_v29 = vpop.f32.mrb[1].mxu0  ;;  %v357_v30 = vadd.f32 %v476_v28, %v340_v27 }
 0x11e   : > { %358 = vst [vmem:[%s250_s6] sm:$0xff] %v357_v30 }
 0x11f PF: > { %s13_s14 = sadd.s32 1, %s604_s14   ;;  %s721_s12 = smov %s600_s13 }
 0x120   : > { %p10_p5 = scmp.ge.s32.totalorder %s13_s14, 4   ;;  %s722_s13 = smov %s724_s15 }
 0x122   :  { %12 = sbr.rel (!%p10_p5) target bundleno = 2 (0x2), region = 76 }

</bundles_post_ra>
